<compile_context>
chip_gen: v5e
topology: v5e:2x2
jax: 0.10.0
libtpu: 0.0.40
codegen_flags: <defaults>
</compile_context>

<pallas_src>
import jax
import jax.numpy as jnp
from jax.experimental import pallas as pl
from jax.experimental.pallas import tpu as pltpu


CONDS_SPEAKER_SIZE = 15          # forced by `conds_utterance_expanded_size + 15`
CONDS_UTTERANCE_SIZE = 55        # 'linguistic' utterance type
LING_EMB_SIZE = 4                # conds_utterance_linguistic_emb_size
CONDS_SIZE = 32                  # conds_size (Linear output width)

# categorical columns of the 55-dim linguistic feature vector
PHONEME_COLS = (2, 3, 4, 5, 6)
VOWEL_COL = 27
GPOS_COLS = (31, 33, 41)
TOBI_COL = 49
# continuous slices, in the exact concat order used by the PyTorch module
CONT_SLICES = ((0, 2), (7, 27), (28, 31), (32, 33), (34, 41), (42, 49), (50, 55))


# ----------------------------- Pallas kernel --------------------------------

def conds_mix_kernel(x_ref, w_ref, sb_ref, o_ref):
    # x:  (1, tt, K)   content tile (bf16 or f32)
    # w:  (K, 32)      content rows of the Linear weight (same dtype as x)
    # sb: (1, 1, 32)   per-batch speaker-term + bias row (f32)
    # o:  (1, tt, 32)  output tile (unpadded 32-wide last dim)
    acc = jnp.dot(x_ref[0], w_ref[...], preferred_element_type=jnp.float32)
    o_ref[0] = (acc + sb_ref[0]).astype(o_ref.dtype)   # (1,32) broadcasts on the VPU


def conds_mix_pallas(content, w_content, spk_bias, *, time_tile=8192,
                     out_dtype=jnp.float32):
    """y[b, t, :] = content[b, t, :] @ w_content + spk_bias[b, :].

    content:   (B, T, K)   bf16 or f32
    w_content: (K, N)      same dtype as content (K, N unpadded)
    spk_bias:  (B, N)      f32, already includes the Linear bias
    returns    (B, T, N)   out_dtype
    """
    B, T, K = content.shape
    Kw, N = w_content.shape
    assert Kw == K and spk_bias.shape == (B, N)

    x_item = jnp.dtype(content.dtype).itemsize
    o_item = jnp.dtype(out_dtype).itemsize

    # VMEM bytes per tile row: double-buffered content + output blocks plus the
    # f32 accumulator temp.  Cap the tile so we stay well under v7x's 64 MiB
    # physical VMEM; raise the scoped limit explicitly only if v5e's 16 MiB
    # default would not cover it.
    per_row = 2 * (K * x_item + N * o_item) + N * 4
    max_tt = max(8, ((36 << 20) // per_row) // 8 * 8)

    tt = min(time_tile, max_tt, T)
    if tt < T:
        tt = max(8, (tt // 8) * 8)          # second-minor block dim multiple of 8
    grid = (pl.cdiv(T, tt), B)              # time-tile axis first: always megacore-shardable

    need = tt * per_row + K * N * x_item + B * N * 4
    compiler_kwargs = dict(dimension_semantics=("parallel", "parallel"))
    if need > (12 << 20):                   # may exceed v5e's 16 MiB default scoped VMEM
        compiler_kwargs["vmem_limit_bytes"] = int(need + (8 << 20))

    cost = pl.CostEstimate(
        flops=2 * B * T * K * N,
        transcendentals=0,
        bytes_accessed=(B * T * K * x_item        # content read
                        + K * N * x_item          # weights (VMEM resident)
                        + B * N * 4               # per-batch speaker+bias rows
                        + B * T * N * o_item))    # output write

    return pl.pallas_call(
        conds_mix_kernel,
        out_shape=jax.ShapeDtypeStruct((B, T, N), out_dtype),
        grid_spec=pl.GridSpec(
            grid=grid,
            in_specs=[
                # Content tile: new block each (t, b) step -> pipelined DMA.
                pl.BlockSpec((1, tt, K), lambda t, b: (b, t, 0)),
                # Weights: constant index_map -> stays VMEM resident across steps.
                pl.BlockSpec((K, N), lambda t, b: (0, 0)),
                # Per-batch speaker+bias row (tiny).
                pl.BlockSpec((1, 1, N), lambda t, b: (b, 0, 0)),
            ],
            out_specs=pl.BlockSpec((1, tt, N), lambda t, b: (b, t, 0)),
        ),
        compiler_params=pltpu.CompilerParams(**compiler_kwargs),
        cost_estimate=cost,
    )(content, w_content, spk_bias.reshape(B, 1, N))


# ------------------------------ Module glue ---------------------------------

def init_params(key, n_speakers, ling_features_size):
    ks = jax.random.split(key, 7)
    exp_size = CONDS_UTTERANCE_SIZE - 10 + 10 * LING_EMB_SIZE          # 85
    fin = exp_size + CONDS_SPEAKER_SIZE                                 # 100
    scale = 1.0 / jnp.sqrt(jnp.float32(fin))
    return {
        "speaker": jax.random.normal(ks[0], (n_speakers, CONDS_SPEAKER_SIZE), jnp.float32),
        "phonemes": jax.random.normal(ks[1], (ling_features_size[0], LING_EMB_SIZE), jnp.float32),
        "vowels": jax.random.normal(ks[2], (ling_features_size[1], LING_EMB_SIZE), jnp.float32),
        "gpos": jax.random.normal(ks[3], (ling_features_size[2], LING_EMB_SIZE), jnp.float32),
        "tobi": jax.random.normal(ks[4], (ling_features_size[3], LING_EMB_SIZE), jnp.float32),
        # stored as (in, out) — transpose of PyTorch's Linear.weight
        "W": jax.random.uniform(ks[5], (fin, CONDS_SIZE), jnp.float32, -scale, scale),
        "b": jax.random.uniform(ks[6], (CONDS_SIZE,), jnp.float32, -scale, scale),
    }


def _content_features(params, utt_conds, dtype=jnp.float32):
    """_forward_content_conds (linguistic).

    The categorical columns are embedded and the continuous columns kept, with
    every piece cast to `dtype` *before* the concat so the (B, T, 85) slab is
    materialized exactly once in the compute dtype (no separate astype pass).
    """
    phon = params["phonemes"].astype(dtype)
    vow = params["vowels"].astype(dtype)
    gpos = params["gpos"].astype(dtype)
    tobi = params["tobi"].astype(dtype)
    feats = []
    for i in PHONEME_COLS:
        feats.append(phon[utt_conds[:, :, i].astype(jnp.int32)])
    feats.append(vow[utt_conds[:, :, VOWEL_COL].astype(jnp.int32)])
    for i in GPOS_COLS:
        feats.append(gpos[utt_conds[:, :, i].astype(jnp.int32)])
    feats.append(tobi[utt_conds[:, :, TOBI_COL].astype(jnp.int32)])
    for lo, hi in CONT_SLICES:
        feats.append(utt_conds[:, :, lo:hi].astype(dtype))
    return jnp.concatenate(feats, axis=2)                               # (B, T, 85)


def conds_mixer_forward(params, utt_conds, speaker_ids, *,
                        compute_dtype=jnp.bfloat16, out_dtype=jnp.float32,
                        time_tile=8192):
    """utt_conds: (B, T, 55) f32; speaker_ids: (B,) int32 -> (B, T, conds_size)."""
    content = _content_features(params, utt_conds, dtype=compute_dtype)  # (B, T, 85)

    W, b = params["W"], params["b"]
    # Split the Linear: speaker rows (first 15 concat inputs) become a per-batch
    # f32 bias computed once in plain JAX; content rows feed the Pallas MXU matmul.
    w_spk = W[:CONDS_SPEAKER_SIZE, :]                                    # (15, 32) f32
    w_cont = W[CONDS_SPEAKER_SIZE:, :].astype(compute_dtype)             # (85, 32)

    spk = params["speaker"][speaker_ids]                                 # (B, 15)
    spk_bias = spk @ w_spk + b[None, :]                                  # (B, 32) f32

    return conds_mix_pallas(content, w_cont, spk_bias,
                            time_tile=time_tile, out_dtype=out_dtype)    # (B, T, 32)


# Pure-JAX reference (mirrors the PyTorch module exactly: concat + full Linear).
def _ref(params, utt_conds, speaker_ids):
    B, T, _ = utt_conds.shape
    content = _content_features(params, utt_conds)                       # f32
    speaker = jnp.broadcast_to(params["speaker"][speaker_ids][:, None, :],
                               (B, T, CONDS_SPEAKER_SIZE))
    x = jnp.concatenate([speaker, content], axis=2)
    return x @ params["W"] + params["b"]


# ---------------------------------- Main -------------------------------------

def _make_inputs(key, B, T, ling_features_size, n_speakers):
    k_cont, k_cat, k_spk = jax.random.split(key, 3)
    utt_conds = jax.random.normal(k_cont, (B, T, CONDS_UTTERANCE_SIZE), jnp.float32)
    cat_cols = list(PHONEME_COLS) + [VOWEL_COL] + list(GPOS_COLS) + [TOBI_COL]
    vocab_sizes = [ling_features_size[0]] * 5 + [ling_features_size[1]] + \
                  [ling_features_size[2]] * 3 + [ling_features_size[3]]
    cat_keys = jax.random.split(k_cat, len(cat_cols))
    for col, vs, ck in zip(cat_cols, vocab_sizes, cat_keys):
        codes = jax.random.randint(ck, (B, T), 0, vs).astype(jnp.float32)
        utt_conds = utt_conds.at[:, :, col].set(codes)
    speaker_ids = jax.random.randint(k_spk, (B,), 0, n_speakers).astype(jnp.int32)
    return utt_conds, speaker_ids


if __name__ == "__main__":
    key = jax.random.PRNGKey(0)
    k_par, k_small, k_big = jax.random.split(key, 3)

    n_speakers = 4
    ling_features_size = (10, 5, 8, 6)   # phonemes, vowels, gpos, tobi vocab sizes
    params = init_params(k_par, n_speakers, ling_features_size)

    # --- Small demo shapes (B=2, T=8), f32 path, checked tight against the ref.
    B, T = 2, 8
    utt_conds, speaker_ids = _make_inputs(k_small, B, T, ling_features_size, n_speakers)

    out = conds_mixer_forward(params, utt_conds, speaker_ids,
                              compute_dtype=jnp.float32)
    out = jax.block_until_ready(out)
    assert out.shape == (B, T, CONDS_SIZE)
    ref = jax.block_until_ready(_ref(params, utt_conds, speaker_ids))
    assert jnp.allclose(out, ref, atol=1e-4, rtol=1e-4)

    # --- Larger run exercising the (time-tile, batch) grid + VMEM-resident weights.
    B2, T2 = 2, 4096
    utt2, spk2 = _make_inputs(k_big, B2, T2, ling_features_size, n_speakers)
    ref2 = jax.block_until_ready(_ref(params, utt2, spk2))

    # f32 multi-tile path: exact.
    out2_f32 = jax.block_until_ready(
        conds_mixer_forward(params, utt2, spk2, compute_dtype=jnp.float32,
                            time_tile=1024))
    assert out2_f32.shape == (B2, T2, CONDS_SIZE)
    assert jnp.allclose(out2_f32, ref2, atol=1e-4, rtol=1e-4)

    # Default bf16 content+weights path (f32 accumulate + f32 bias add).
    out2 = jax.block_until_ready(
        conds_mixer_forward(params, utt2, spk2, time_tile=1024))
    assert out2.shape == (B2, T2, CONDS_SIZE) and out2.dtype == jnp.float32
    assert jnp.allclose(out2, ref2, atol=5e-2, rtol=5e-2)

    # --- bf16 output path (halves the output HBM stream if the consumer allows).
    out3 = jax.block_until_ready(
        conds_mixer_forward(params, utt2, spk2, out_dtype=jnp.bfloat16))
    assert out3.shape == (B2, T2, CONDS_SIZE) and out3.dtype == jnp.bfloat16
    assert jnp.allclose(out3.astype(jnp.float32), ref2, atol=7e-2, rtol=7e-2)

    print("KERNEL_OK")
</pallas_src>

<mosaic_0001>
module attributes {stable_mosaic.version = 11 : i64} {
  func.func @conds_mix_kernel(%arg0: i32, %arg1: i32, %arg2: memref<1x8x85xf32, #tpu.memory_space<vmem>>, %arg3: memref<85x32xf32, #tpu.memory_space<vmem>>, %arg4: memref<1x1x32xf32, #tpu.memory_space<vmem>>, %arg5: memref<1x8x32xf32, #tpu.memory_space<vmem>>) attributes {dimension_semantics = [#tpu.dimension_semantics<parallel>, #tpu.dimension_semantics<parallel>], iteration_bounds = array<i64: 1, 2>, scalar_prefetch = 0 : i64, scratch_operands = 0 : i64, tpu.core_type = #tpu.core_type<tc>, window_params = [{transform_indices = @transform_0, window_bounds = array<i64: 1, 8, 85>}, {pipeline_mode = #tpu.pipeline_mode<synchronous>, transform_indices = @transform_1, window_bounds = array<i64: 85, 32>}, {transform_indices = @transform_2, window_bounds = array<i64: 1, 1, 32>}, {transform_indices = @transform_3, window_bounds = array<i64: 1, 8, 32>}]} {
    %c0 = arith.constant 0 : index
    %c0_0 = arith.constant 0 : index
    %c0_1 = arith.constant 0 : index
    %0 = vector.load %arg2[%c0, %c0_0, %c0_1] : memref<1x8x85xf32, #tpu.memory_space<vmem>>, vector<1x8x85xf32>
    %1 = vector.shape_cast %0 : vector<1x8x85xf32> to vector<8x85xf32>
    %c0_2 = arith.constant 0 : index
    %c0_3 = arith.constant 0 : index
    %2 = vector.load %arg3[%c0_2, %c0_3] : memref<85x32xf32, #tpu.memory_space<vmem>>, vector<85x32xf32>
    %cst = arith.constant dense<0.000000e+00> : vector<8x32xf32>
    %3 = tpu.matmul %1, %2, %cst {dimension_numbers = #tpu.dot_dimension_numbers<[1], [0], [0], [1], [0, 0, 1, 1], [], []>} : vector<8x85xf32>, vector<85x32xf32>, vector<8x32xf32> -> vector<8x32xf32>
    %c0_4 = arith.constant 0 : index
    %c0_5 = arith.constant 0 : index
    %c0_6 = arith.constant 0 : index
    %4 = vector.load %arg4[%c0_4, %c0_5, %c0_6] : memref<1x1x32xf32, #tpu.memory_space<vmem>>, vector<1x1x32xf32>
    %5 = vector.shape_cast %4 : vector<1x1x32xf32> to vector<1x32xf32>
    %6 = vector.broadcast %5 : vector<1x32xf32> to vector<8x32xf32>
    %7 = arith.addf %3, %6 : vector<8x32xf32>
    %c0_7 = arith.constant 0 : index
    %c0_8 = arith.constant 0 : index
    %c0_9 = arith.constant 0 : index
    %8 = vector.load %arg5[%c0_7, %c0_8, %c0_9] : memref<1x8x32xf32, #tpu.memory_space<vmem>>, vector<1x8x32xf32>
    %9 = vector.shape_cast %8 : vector<1x8x32xf32> to vector<8x32xf32>
    %10 = vector.shape_cast %7 : vector<8x32xf32> to vector<1x8x32xf32>
    tpu.vector_store %arg5[%c0_7, %c0_8, %c0_9], %10 {strides = array<i32>} : memref<1x8x32xf32, #tpu.memory_space<vmem>>, vector<1x8x32xf32>,
    return
  }
  func.func @transform_0(%arg0: i32, %arg1: i32) -> (i32, i32, i32) {
    %c0_i32 = arith.constant 0 : i32
    %c0_i32_0 = arith.constant 0 : i32
    return %arg1, %arg0, %c0_i32 : i32, i32, i32
  }
  func.func @transform_1(%arg0: i32, %arg1: i32) -> (i32, i32) {
    %c0_i32 = arith.constant 0 : i32
    %c0_i32_0 = arith.constant 0 : i32
    %c0_i32_1 = arith.constant 0 : i32
    return %c0_i32, %c0_i32_0 : i32, i32
  }
  func.func @transform_2(%arg0: i32, %arg1: i32) -> (i32, i32, i32) {
    %c0_i32 = arith.constant 0 : i32
    %c0_i32_0 = arith.constant 0 : i32
    %c0_i32_1 = arith.constant 0 : i32
    return %arg1, %c0_i32, %c0_i32_0 : i32, i32, i32
  }
  func.func @transform_3(%arg0: i32, %arg1: i32) -> (i32, i32, i32) {
    %c0_i32 = arith.constant 0 : i32
    %c0_i32_0 = arith.constant 0 : i32
    return %arg1, %arg0, %c0_i32 : i32, i32, i32
  }
}

</mosaic_0001>

<bundles_post_ra>
// kernel: tpu_custom_call.1
= control target key start
LH: loop header
LB: loop body
LE: loop exit
PB: predicated region body
PF: predicated region fallthrough
CT: control target
= control target key end

     0   :  { %8 = vsyncpa [#allocation3], 0  ;;  %s654_s0 = inlined_call_operand.vmem [shape: f32[2,8,85], index: 0, kind: input, shape index: {}]   ;;  %s655_s1 = inlined_call_operand.vmem [shape: f32[85,32], index: 1, kind: input, shape index: {}]   ;;  %s656_s2 = inlined_call_operand.vmem [shape: f32[2,1,32], index: 2, kind: input, shape index: {}]   ;;  %s657_s3 = inlined_call_operand.hbm [shape: f32[2,8,32], index: 3, kind: output, shape index: {}]  }
   0x1   :  { %10 = vsyncpa [#allocation3 + $0x1], 0  ;;  %s517_s12 = smov 0   ;;  %s519_s13 = smov 0  }
   0x2   :  { %s521_s14 = smov 0   ;;  %s523_s15 = smov 0  }
   0x3   :  { %s525_s16 = smov 0   ;;  %s527_s17 = smov 0  }
   0x4 LB: > { %s348_s18 = sadd.s32 4294967295, %s495_s17   ;;  %s349_s19 = sadd.s32 4294967294, %s495_s17   ;;  %s495_s17 = sphi %s527_s17, %s16_s17   ;;  %s491_s16 = sphi %s525_s16, %s664_s16   ;;  %s487_s15 = sphi %s523_s15, %s663_s15   ;;  %s483_s14 = sphi %s521_s14, %s662_s14   ;;  %s479_s13 = sphi %s519_s13, %s661_s13   ;;  %s475_s12 = sphi %s517_s12, %s660_s12  }
   0x5   : > { %s25_s20 = sadd.s32 1, %s491_s16  ;;  %s112_s21 = sadd.s32 1, %s483_s14 }
   0x6   : > { %p26_p0 = scmp.ge.s32.totalorder %s25_s20, 2  ;;  %p122_p1 = scmp.ne.s32.totalorder %s483_s14, %s479_s13 }
   0x7   : > { %p123_p2 = scmp.eq.s32.totalorder %s348_s18, 1  ;;  %p128_p3 = scmp.ne.s32.totalorder %s479_s13, %s475_s12 }
   0x8   : > { %s666_s20 = smov (%p26_p0, %s25_s20), 0  ;;  %p129_p5 = scmp.eq.s32.totalorder %s349_s19, 1 }
   0x9   : > { %p557_p4 = por %p123_p2, %p122_p1  ;;  %s107_s23 = ssub.s32 %s491_s16, %s666_s20 }
   0xa   : > { %p352_p6 = scmp.ge.s32.totalorder %s495_s17, 1  ;;  %p110_p7 = scmp.eq.s32.totalorder %s107_s23, 0 }
   0xb   : > { %p564_p8 = por %p129_p5, %p128_p3  ;;  %p166_p9 = scmp.lt.s32.totalorder %s495_s17, 3 }
   0xc   : > { %s570_s25 = scalar_select %p110_p7, %s483_s14, %s112_s21  }
   0xd   : > { %p167_p10 = pnand %p352_p6, %p166_p9 }
   0xe   : > { %p195_p11 = scmp.lt.s32.totalorder (!%p167_p10), %s487_s15, 1  ;;  %s358_s23 = sshll.u32 (!%p167_p10), %s487_s15, 3 }
   0xf   : > { %170 = sbr.rel (%p167_p10) target bundleno = 173 (0xad), region = 32  ;;  %s263_s28 = scalar_lea.hbm (!%p167_p10), %s657_s3, %s358_s23 }
  0x10   : > { %s267_s4 = sshll.u32 (!%p167_p10), %s263_s28, 4  ;;  %s268_s4 = int_to_ptr.hbm [resolvable:$true] %s267_s4 }
  0x11   : > { %s431_s7 = sshra.s32 (!%p167_p10), %s268_s4, 4  ;;  %s432_s7 = int_to_ptr.hbm [resolvable:$true] %s431_s7 }
  0x12   : > { %s433_s8 = scalar_lea.hbm (!%p167_p10), %s432_s7, 8  ;;  %p438_p1 = scmp.lt.s32.totalorder (!%p167_p10), %s432_s7, %s657_s3 }
  0x13   : > { %p434_p12 = scmp.ne.s32.totalorder (!%p167_p10), %s432_s7, %s433_s8 }
  0x14   : > { %v216_v0 = vld [vmem:[%s655_s1 + $0x50] sm:$0x1f]  ;;  %vm225_vm0 = vcmask 1044480   ;;  %v215_v1 = vld [vmem:[%s655_s1 + $0x48] sm:$0xff]  ;;  %v214_v2 = vld [vmem:[%s655_s1 + $0x40] sm:$0xff]  ;;  %s583_s5 = scalar_select %p195_p11, %s487_s15, 1 }
  0x15   : > { %355 = vmatpush.msk.msra.mxu0 %vm225_vm0, %v216_v0  ;;  %v213_v3 = vld [vmem:[%s655_s1 + $0x38] sm:$0xff]  ;;  %v212_v4 = vld [vmem:[%s655_s1 + $0x30] sm:$0xff]  ;;  %v211_v5 = vld [vmem:[%s655_s1 + $0x28] sm:$0xff]  ;;  %vm221_vm1 = vcmask 695296   ;;  %vm249_vm2 = vcmask 261120   ;;  %p435_p13 = pnand %p434_p12, %p557_p4 }
  0x16   : > { %s204_s10 = scalar_lea.vmem %s656_s2, %s583_s5  ;;  %v210_v6 = vld [vmem:[%s655_s1 + $0x20] sm:$0xff]  ;;  %v209_v7 = vld [vmem:[%s655_s1 + $0x18] sm:$0xff]  ;;  %s354_s29 = sshll.u32 %s583_s5, 3  ;;  %v208_v8 = vld [vmem:[%s655_s1 + $0x10] sm:$0xff] }
  0x17   : > { %235 = vmatpush.msra.mxu0 %v215_v1  ;;  %v207_v9 = vld [vmem:[%s655_s1 + $0x8] sm:$0xff]  ;;  %s201_s11 = scalar_lea.vmem %s654_s0, %s354_s29  ;;  %v206_v10 = vld [vmem:[%s655_s1] sm:$0xff]  ;;  %s192_s5 = sand.u32 1, %s479_s13  }
  0x18   : > { %v205_v11 = vld [vmem:[%s201_s11] sm:$0xff]  ;;  %s353_s21 = sshll.u32 %s192_s5, 3  ;;  %s252_s6 = scalar_lea.sflag [#allocation3], %s192_s5 }
  0x19   : > { %236 = vmatpush.msra.mxu0 %v214_v2  ;;  %v416_v12 = vld [vmem:[%s204_s10] ss:$0 sm:$0xff]  ;;  %s194_s29 = scalar_lea.vmem [#allocation2], %s353_s21  ;;  %p436_p0 = pneg %p435_p13 }
  0x1a   : > { %s265_s30 = sshll.u32 %s194_s29, 4  ;;  %s437_s10 = scalar_lea.hbm %s657_s3, 16  ;;  %s266_s30 = int_to_ptr.vmem [resolvable:$true] %s265_s30 }
  0x1b   : > { %237 = vmatpush.msra.mxu0 %v213_v3  ;;  %p439_p2 = scmp.lt.s32.totalorder %s437_s10, %s433_s8 }
  0x1d   : > { %238 = vmatpush.msra.mxu0 %v212_v4  ;;  %p440_p3 = por %p439_p2, %p438_p1 }
  0x1f   : > { %239 = vmatpush.msra.mxu0 %v211_v5  ;;  %p441_p5 = pnand %p440_p3, %p436_p0 }
  0x21   : > { %240 = vmatpush.msra.mxu0 %v210_v6 }
  0x23   : > { %241 = vmatpush.msra.mxu0 %v209_v7 }
  0x25   : > { %242 = vmatpush.msra.mxu0 %v208_v8 }
  0x27   : > { %243 = vmatpush.msra.mxu0 %v207_v9 }
  0x29   : > { %244 = vmatpush.msra.mxu0 %v206_v10 }
  0x2a   : > { %356 = vmatmul.msk.f32.vlgmr.msra.gmra.mxu0 %vm221_vm1, %v205_v11 }
  0xa7   : > { %v246_v13 = vpop.f32.mrf.mxu0 }
  0xa8   : > { %v247_v14 = vadd.f32 %v416_v12, %v246_v13 }
  0xaa   : > { %250 = vst.msk [vmem:[%s194_s29] sm:$0xff] %vm249_vm2, %v247_v14 }
  0xab   : > { %444 = shalt.err (!%p441_p5)
}
  0xac   : > { %361 = dma.vmem_to_hbm [thread:$0]  (%p557_p4), %s266_s30, 128, %s268_s4, %s252_s6  }
  0xad PF: > { %p367_p6 = scmp.ge.s32.totalorder %s495_s17, 2  ;;  %s279_s19 = sand.u32 1, %s475_s12  }
  0xae   : > { %s280_s5 = scalar_lea.sflag [#allocation3], %s279_s19 }
  0xaf   : > { %p364_p7 = pnand %p367_p6, %p564_p8 }
  0xb1   : > { %p365_p9 = pneg %p364_p7 }
  0xb3   : > { %470 = dma.done.wait (%p365_p9), %s280_s5, 128  }
  0xb4   : > { %472 = vsyncadd (%p365_p9), %s280_s5, 4294967168  ;;  %s16_s17 = sadd.s32 1, %s495_s17   ;;  %s660_s12 = smov %s479_s13 }
  0xb5   : > { %p13_p10 = scmp.ge.s32.totalorder %s16_s17, 4   ;;  %s661_s13 = smov %s483_s14 }
  0xb6   : > { %s662_s14 = smov %s570_s25  ;;  %s663_s15 = smov %s491_s16 }
  0xb7   : > { %s664_s16 = smov %s666_s20  ;;  %15 = sbr.rel (!%p13_p10) target bundleno = 4 (0x4), region = 70 }
  0xbc   :  { %286 = vsyncpa [#allocation3], 1 }
  0xbd   :  { %288 = vsyncpa [#allocation3 + $0x1], 1 }

</bundles_post_ra>
